<compile_context>
chip_gen: v7x
topology: tpu7x:2x2x1
jax: 0.10.0
libtpu: 0.0.40
codegen_flags: <defaults>
</compile_context>

<pallas_src>
import jax
import jax.numpy as jnp
from jax.experimental import pallas as pl
from jax.experimental.pallas import tpu as pltpu

# Network dims fixed by the module: state_dim -> 64 -> 128 -> 64 -> n_actions
H1, H2, H3 = 64, 128, 64

# Layout padding constants.
IN_PAD = 8        # input feature dim padded 6 -> 8 (sublane-friendly K)
OUT_PAD = 128     # output lane dim padded n_actions -> 128 (lane-dense stores)
MAX_TILE_B = 1024 # cap so huge batches still pipeline; VMEM never binds here


def _round_up(n, m):
    return ((n + m - 1) // m) * m


def _choose_tile_b(batch):
    """Adaptive batch tile.

    B <= 32  -> one tile covering the (16-rounded) batch: no wasted MXU rows
                or DMA for the common small-batch RL inference case.
    B  > 32  -> two grid steps (even split keeps both v7x TCs busy; on
                single-TC v5e/v6e it is still only one extra ~0.35us step),
                capped at MAX_TILE_B rows.
    Multiples of 16 keep the in-kernel half-split sublane aligned.
    """
    if batch <= 32:
        return max(16, _round_up(batch, 16))
    half = _round_up((batch + 1) // 2, 16)
    return min(MAX_TILE_B, half)


def _mlp_kernel(x_ref,
                w1_ref, b1_ref,
                w2_ref, b2_ref,
                w3_ref, b3_ref,
                w4_ref, b4_ref,
                o_ref):
    def chain(x):
        # bf16 MXU inputs, f32 accumulation, f32 bias/ReLU epilogue
        # (v5e-safe; modest extra VALU work on v6e/v7x is not the bottleneck).
        h = jnp.dot(x, w1_ref[...],
                    preferred_element_type=jnp.float32) + b1_ref[...]
        h = jnp.maximum(h, 0.0).astype(jnp.bfloat16)
        h = jnp.dot(h, w2_ref[...],
                    preferred_element_type=jnp.float32) + b2_ref[...]
        h = jnp.maximum(h, 0.0).astype(jnp.bfloat16)
        h = jnp.dot(h, w3_ref[...],
                    preferred_element_type=jnp.float32) + b3_ref[...]
        h = jnp.maximum(h, 0.0).astype(jnp.bfloat16)
        return jnp.dot(h, w4_ref[...],
                       preferred_element_type=jnp.float32) + b4_ref[...]

    # Two independent half-tiles break the serial 4-matmul dependency chain;
    # the LLO scheduler interleaves them so the MXU stays fed across layer
    # boundaries.  half is a multiple of 8 (tile_b is a multiple of 16).
    half = x_ref.shape[0] // 2
    o_ref[:half, :] = chain(x_ref[:half, :]).astype(o_ref.dtype)
    o_ref[half:, :] = chain(x_ref[half:, :]).astype(o_ref.dtype)


def _resident_spec(shape):
    # Full-array block with a constant block index -> stays VMEM-resident
    # across all batch-grid steps (fetched once, never re-DMA'd).
    return pl.BlockSpec(shape, lambda i: (0,) * len(shape))


def acrobot_mlp_forward(x, params, n_actions):
    """x: (B, state_dim) float32.
    params: dict of bf16 weights `w1..w4` pre-transposed to (in, out) and
    zero-padded (w1 rows -> IN_PAD, w4 cols -> OUT_PAD), plus f32 biases
    `b1..b4` of shape (1, out) (b4 padded to OUT_PAD).
    n_actions: static Python int."""
    B, state_dim = x.shape
    tile_b = _choose_tile_b(B)
    b_pad = _round_up(B, tile_b)

    # Single fused pad op (zero rows/cols are exact: they hit zero weight rows
    # and padded batch rows are sliced away below).
    x_p = jnp.pad(x.astype(jnp.bfloat16),
                  ((0, b_pad - B), (0, IN_PAD - state_dim)))

    inputs = (
        x_p,
        params["w1"], params["b1"],
        params["w2"], params["b2"],
        params["w3"], params["b3"],
        params["w4"], params["b4"],
    )

    in_specs = [pl.BlockSpec((tile_b, IN_PAD), lambda i: (i, 0))] + [
        _resident_spec(a.shape) for a in inputs[1:]
    ]
    out_spec = pl.BlockSpec((tile_b, OUT_PAD), lambda i: (i, 0))

    weight_bytes = sum(int(a.size) * a.dtype.itemsize for a in inputs[1:])
    cost = pl.CostEstimate(
        flops=2 * b_pad * (IN_PAD * H1 + H1 * H2 + H2 * H3 + H3 * OUT_PAD),
        transcendentals=0,
        bytes_accessed=int(x_p.size) * 2 + weight_bytes + b_pad * OUT_PAD * 2,
    )

    out_padded = pl.pallas_call(
        _mlp_kernel,
        out_shape=jax.ShapeDtypeStruct((b_pad, OUT_PAD), jnp.bfloat16),
        grid=(b_pad // tile_b,),
        in_specs=in_specs,
        out_specs=out_spec,
        compiler_params=pltpu.CompilerParams(
            dimension_semantics=("parallel",)),
        cost_estimate=cost,
    )(*inputs)

    return out_padded[:B, :n_actions].astype(jnp.float32)


def init_params(key, state_dim, n_actions):
    """PyTorch-Linear-like init (U[-1/sqrt(fan_in), +bound]); weights stored
    transposed to (in, out), zero-padded to kernel-friendly shapes, cast bf16."""
    dims = [(state_dim, H1), (H1, H2), (H2, H3), (H3, n_actions)]
    params = {}
    for i, (fan_in, fan_out) in enumerate(dims, start=1):
        key, kw, kb = jax.random.split(key, 3)
        bound = 1.0 / jnp.sqrt(fan_in)
        w = jax.random.uniform(kw, (fan_in, fan_out), jnp.float32, -bound, bound)
        b = jax.random.uniform(kb, (1, fan_out), jnp.float32, -bound, bound)
        if i == 1:   # pad input-feature rows state_dim -> IN_PAD with zeros
            w = jnp.zeros((IN_PAD, fan_out), jnp.float32).at[:fan_in, :].set(w)
        if i == 4:   # pad output columns n_actions -> OUT_PAD with zeros
            w = jnp.zeros((fan_in, OUT_PAD), jnp.float32).at[:, :fan_out].set(w)
            b = jnp.zeros((1, OUT_PAD), jnp.float32).at[:, :fan_out].set(b)
        params[f"w{i}"] = w.astype(jnp.bfloat16)
        params[f"b{i}"] = b                      # biases stay f32
    return params


def reference_forward(x, params, n_actions):
    """Pure-JAX reference with the exact same bf16/f32 numerics as the kernel
    (bf16 matmul inputs, f32 accumulate, f32 bias/ReLU, bf16 output store)."""
    B, state_dim = x.shape
    h = jnp.pad(x.astype(jnp.bfloat16), ((0, 0), (0, IN_PAD - state_dim)))
    for i in range(1, 5):
        h = jnp.dot(h, params[f"w{i}"],
                    preferred_element_type=jnp.float32) + params[f"b{i}"]
        if i < 4:
            h = jnp.maximum(h, 0.0).astype(jnp.bfloat16)
    h = h.astype(jnp.bfloat16)                   # match kernel's bf16 writeback
    return h[:, :n_actions].astype(jnp.float32)


if __name__ == "__main__":
    state_dim = 6    # Acrobot-v1 observation size
    n_actions = 3    # Acrobot-v1 action count

    key = jax.random.PRNGKey(0)
    key, kx = jax.random.split(key)
    params = init_params(key, state_dim, n_actions)

    # Small batch (single adaptive tile) and larger batch (two grid steps).
    for batch in (4, 512):
        kx, kb = jax.random.split(kx)
        x = jax.random.normal(kb, (batch, state_dim), jnp.float32)

        out = acrobot_mlp_forward(x, params, n_actions)
        jax.block_until_ready(out)

        ref = reference_forward(x, params, n_actions)
        assert out.shape == (batch, n_actions)
        err = float(jnp.max(jnp.abs(out - ref)))
        assert jnp.allclose(out, ref, atol=1e-3, rtol=1e-3), err

    print("KERNEL_OK")
</pallas_src>

<mosaic_0001>
module attributes {stable_mosaic.version = 11 : i64} {
  func.func @_mlp_kernel(%arg0: i32, %arg1: memref<16x8xbf16, #tpu.memory_space<vmem>>, %arg2: memref<8x64xbf16, #tpu.memory_space<vmem>>, %arg3: memref<1x64xf32, #tpu.memory_space<vmem>>, %arg4: memref<64x128xbf16, #tpu.memory_space<vmem>>, %arg5: memref<1x128xf32, #tpu.memory_space<vmem>>, %arg6: memref<128x64xbf16, #tpu.memory_space<vmem>>, %arg7: memref<1x64xf32, #tpu.memory_space<vmem>>, %arg8: memref<64x128xbf16, #tpu.memory_space<vmem>>, %arg9: memref<1x128xf32, #tpu.memory_space<vmem>>, %arg10: memref<16x128xbf16, #tpu.memory_space<vmem>>) attributes {dimension_semantics = [#tpu.dimension_semantics<parallel>], iteration_bounds = array<i64: 1>, scalar_prefetch = 0 : i64, scratch_operands = 0 : i64, tpu.core_type = #tpu.core_type<tc>, window_params = [{transform_indices = @transform_0, window_bounds = array<i64: 16, 8>}, {pipeline_mode = #tpu.pipeline_mode<synchronous>, transform_indices = @transform_1, window_bounds = array<i64: 8, 64>}, {pipeline_mode = #tpu.pipeline_mode<synchronous>, transform_indices = @transform_2, window_bounds = array<i64: 1, 64>}, {pipeline_mode = #tpu.pipeline_mode<synchronous>, transform_indices = @transform_3, window_bounds = array<i64: 64, 128>}, {pipeline_mode = #tpu.pipeline_mode<synchronous>, transform_indices = @transform_4, window_bounds = array<i64: 1, 128>}, {pipeline_mode = #tpu.pipeline_mode<synchronous>, transform_indices = @transform_5, window_bounds = array<i64: 128, 64>}, {pipeline_mode = #tpu.pipeline_mode<synchronous>, transform_indices = @transform_6, window_bounds = array<i64: 1, 64>}, {pipeline_mode = #tpu.pipeline_mode<synchronous>, transform_indices = @transform_7, window_bounds = array<i64: 64, 128>}, {pipeline_mode = #tpu.pipeline_mode<synchronous>, transform_indices = @transform_8, window_bounds = array<i64: 1, 128>}, {transform_indices = @transform_9, window_bounds = array<i64: 16, 128>}]} {
    %c0 = arith.constant 0 : index
    %c0_0 = arith.constant 0 : index
    %0 = vector.load %arg1[%c0, %c0_0] : memref<16x8xbf16, #tpu.memory_space<vmem>>, vector<8x8xbf16>
    %c0_1 = arith.constant 0 : index
    %c0_2 = arith.constant 0 : index
    %1 = vector.load %arg2[%c0_1, %c0_2] : memref<8x64xbf16, #tpu.memory_space<vmem>>, vector<8x64xbf16>
    %cst = arith.constant dense<0.000000e+00> : vector<8x64xf32>
    %2 = tpu.matmul %0, %1, %cst {dimension_numbers = #tpu.dot_dimension_numbers<[1], [0], [0], [1], [0, 0, 1, 1], [], []>} : vector<8x8xbf16>, vector<8x64xbf16>, vector<8x64xf32> -> vector<8x64xf32>
    %c0_3 = arith.constant 0 : index
    %c0_4 = arith.constant 0 : index
    %3 = vector.load %arg3[%c0_3, %c0_4] : memref<1x64xf32, #tpu.memory_space<vmem>>, vector<1x64xf32>
    %4 = vector.broadcast %3 : vector<1x64xf32> to vector<8x64xf32>
    %5 = arith.addf %2, %4 : vector<8x64xf32>
    %cst_5 = arith.constant 0.000000e+00 : f32
    %6 = vector.broadcast %cst_5 : f32 to vector<8x64xf32>
    %7 = arith.maximumf %5, %6 : vector<8x64xf32>
    %8 = arith.truncf %7 : vector<8x64xf32> to vector<8x64xbf16>
    %c0_6 = arith.constant 0 : index
    %c0_7 = arith.constant 0 : index
    %9 = vector.load %arg4[%c0_6, %c0_7] : memref<64x128xbf16, #tpu.memory_space<vmem>>, vector<64x128xbf16>
    %cst_8 = arith.constant dense<0.000000e+00> : vector<8x128xf32>
    %10 = tpu.matmul %8, %9, %cst_8 {dimension_numbers = #tpu.dot_dimension_numbers<[1], [0], [0], [1], [0, 0, 1, 1], [], []>} : vector<8x64xbf16>, vector<64x128xbf16>, vector<8x128xf32> -> vector<8x128xf32>
    %c0_9 = arith.constant 0 : index
    %c0_10 = arith.constant 0 : index
    %11 = vector.load %arg5[%c0_9, %c0_10] : memref<1x128xf32, #tpu.memory_space<vmem>>, vector<1x128xf32>
    %12 = vector.broadcast %11 : vector<1x128xf32> to vector<8x128xf32>
    %13 = arith.addf %10, %12 : vector<8x128xf32>
    %cst_11 = arith.constant 0.000000e+00 : f32
    %14 = vector.broadcast %cst_11 : f32 to vector<8x128xf32>
    %15 = arith.maximumf %13, %14 : vector<8x128xf32>
    %16 = arith.truncf %15 : vector<8x128xf32> to vector<8x128xbf16>
    %c0_12 = arith.constant 0 : index
    %c0_13 = arith.constant 0 : index
    %17 = vector.load %arg6[%c0_12, %c0_13] : memref<128x64xbf16, #tpu.memory_space<vmem>>, vector<128x64xbf16>
    %cst_14 = arith.constant dense<0.000000e+00> : vector<8x64xf32>
    %18 = tpu.matmul %16, %17, %cst_14 {dimension_numbers = #tpu.dot_dimension_numbers<[1], [0], [0], [1], [0, 0, 1, 1], [], []>} : vector<8x128xbf16>, vector<128x64xbf16>, vector<8x64xf32> -> vector<8x64xf32>
    %c0_15 = arith.constant 0 : index
    %c0_16 = arith.constant 0 : index
    %19 = vector.load %arg7[%c0_15, %c0_16] : memref<1x64xf32, #tpu.memory_space<vmem>>, vector<1x64xf32>
    %20 = vector.broadcast %19 : vector<1x64xf32> to vector<8x64xf32>
    %21 = arith.addf %18, %20 : vector<8x64xf32>
    %cst_17 = arith.constant 0.000000e+00 : f32
    %22 = vector.broadcast %cst_17 : f32 to vector<8x64xf32>
    %23 = arith.maximumf %21, %22 : vector<8x64xf32>
    %24 = arith.truncf %23 : vector<8x64xf32> to vector<8x64xbf16>
    %c0_18 = arith.constant 0 : index
    %c0_19 = arith.constant 0 : index
    %25 = vector.load %arg8[%c0_18, %c0_19] : memref<64x128xbf16, #tpu.memory_space<vmem>>, vector<64x128xbf16>
    %cst_20 = arith.constant dense<0.000000e+00> : vector<8x128xf32>
    %26 = tpu.matmul %24, %25, %cst_20 {dimension_numbers = #tpu.dot_dimension_numbers<[1], [0], [0], [1], [0, 0, 1, 1], [], []>} : vector<8x64xbf16>, vector<64x128xbf16>, vector<8x128xf32> -> vector<8x128xf32>
    %c0_21 = arith.constant 0 : index
    %c0_22 = arith.constant 0 : index
    %27 = vector.load %arg9[%c0_21, %c0_22] : memref<1x128xf32, #tpu.memory_space<vmem>>, vector<1x128xf32>
    %28 = vector.broadcast %27 : vector<1x128xf32> to vector<8x128xf32>
    %29 = arith.addf %26, %28 : vector<8x128xf32>
    %30 = arith.truncf %29 : vector<8x128xf32> to vector<8x128xbf16>
    %c0_23 = arith.constant 0 : index
    %c0_24 = arith.constant 0 : index
    %31 = vector.load %arg10[%c0_23, %c0_24] : memref<16x128xbf16, #tpu.memory_space<vmem>>, vector<8x128xbf16>
    tpu.vector_store %arg10[%c0_23, %c0_24], %30 {strides = array<i32>} : memref<16x128xbf16, #tpu.memory_space<vmem>>, vector<8x128xbf16>,
    %c8 = arith.constant 8 : index
    %c0_25 = arith.constant 0 : index
    %32 = vector.load %arg1[%c8, %c0_25] : memref<16x8xbf16, #tpu.memory_space<vmem>>, vector<8x8xbf16>
    %c0_26 = arith.constant 0 : index
    %c0_27 = arith.constant 0 : index
    %33 = vector.load %arg2[%c0_26, %c0_27] : memref<8x64xbf16, #tpu.memory_space<vmem>>, vector<8x64xbf16>
    %cst_28 = arith.constant dense<0.000000e+00> : vector<8x64xf32>
    %34 = tpu.matmul %32, %33, %cst_28 {dimension_numbers = #tpu.dot_dimension_numbers<[1], [0], [0], [1], [0, 0, 1, 1], [], []>} : vector<8x8xbf16>, vector<8x64xbf16>, vector<8x64xf32> -> vector<8x64xf32>
    %c0_29 = arith.constant 0 : index
    %c0_30 = arith.constant 0 : index
    %35 = vector.load %arg3[%c0_29, %c0_30] : memref<1x64xf32, #tpu.memory_space<vmem>>, vector<1x64xf32>
    %36 = vector.broadcast %35 : vector<1x64xf32> to vector<8x64xf32>
    %37 = arith.addf %34, %36 : vector<8x64xf32>
    %cst_31 = arith.constant 0.000000e+00 : f32
    %38 = vector.broadcast %cst_31 : f32 to vector<8x64xf32>
    %39 = arith.maximumf %37, %38 : vector<8x64xf32>
    %40 = arith.truncf %39 : vector<8x64xf32> to vector<8x64xbf16>
    %c0_32 = arith.constant 0 : index
    %c0_33 = arith.constant 0 : index
    %41 = vector.load %arg4[%c0_32, %c0_33] : memref<64x128xbf16, #tpu.memory_space<vmem>>, vector<64x128xbf16>
    %cst_34 = arith.constant dense<0.000000e+00> : vector<8x128xf32>
    %42 = tpu.matmul %40, %41, %cst_34 {dimension_numbers = #tpu.dot_dimension_numbers<[1], [0], [0], [1], [0, 0, 1, 1], [], []>} : vector<8x64xbf16>, vector<64x128xbf16>, vector<8x128xf32> -> vector<8x128xf32>
    %c0_35 = arith.constant 0 : index
    %c0_36 = arith.constant 0 : index
    %43 = vector.load %arg5[%c0_35, %c0_36] : memref<1x128xf32, #tpu.memory_space<vmem>>, vector<1x128xf32>
    %44 = vector.broadcast %43 : vector<1x128xf32> to vector<8x128xf32>
    %45 = arith.addf %42, %44 : vector<8x128xf32>
    %cst_37 = arith.constant 0.000000e+00 : f32
    %46 = vector.broadcast %cst_37 : f32 to vector<8x128xf32>
    %47 = arith.maximumf %45, %46 : vector<8x128xf32>
    %48 = arith.truncf %47 : vector<8x128xf32> to vector<8x128xbf16>
    %c0_38 = arith.constant 0 : index
    %c0_39 = arith.constant 0 : index
    %49 = vector.load %arg6[%c0_38, %c0_39] : memref<128x64xbf16, #tpu.memory_space<vmem>>, vector<128x64xbf16>
    %cst_40 = arith.constant dense<0.000000e+00> : vector<8x64xf32>
    %50 = tpu.matmul %48, %49, %cst_40 {dimension_numbers = #tpu.dot_dimension_numbers<[1], [0], [0], [1], [0, 0, 1, 1], [], []>} : vector<8x128xbf16>, vector<128x64xbf16>, vector<8x64xf32> -> vector<8x64xf32>
    %c0_41 = arith.constant 0 : index
    %c0_42 = arith.constant 0 : index
    %51 = vector.load %arg7[%c0_41, %c0_42] : memref<1x64xf32, #tpu.memory_space<vmem>>, vector<1x64xf32>
    %52 = vector.broadcast %51 : vector<1x64xf32> to vector<8x64xf32>
    %53 = arith.addf %50, %52 : vector<8x64xf32>
    %cst_43 = arith.constant 0.000000e+00 : f32
    %54 = vector.broadcast %cst_43 : f32 to vector<8x64xf32>
    %55 = arith.maximumf %53, %54 : vector<8x64xf32>
    %56 = arith.truncf %55 : vector<8x64xf32> to vector<8x64xbf16>
    %c0_44 = arith.constant 0 : index
    %c0_45 = arith.constant 0 : index
    %57 = vector.load %arg8[%c0_44, %c0_45] : memref<64x128xbf16, #tpu.memory_space<vmem>>, vector<64x128xbf16>
    %cst_46 = arith.constant dense<0.000000e+00> : vector<8x128xf32>
    %58 = tpu.matmul %56, %57, %cst_46 {dimension_numbers = #tpu.dot_dimension_numbers<[1], [0], [0], [1], [0, 0, 1, 1], [], []>} : vector<8x64xbf16>, vector<64x128xbf16>, vector<8x128xf32> -> vector<8x128xf32>
    %c0_47 = arith.constant 0 : index
    %c0_48 = arith.constant 0 : index
    %59 = vector.load %arg9[%c0_47, %c0_48] : memref<1x128xf32, #tpu.memory_space<vmem>>, vector<1x128xf32>
    %60 = vector.broadcast %59 : vector<1x128xf32> to vector<8x128xf32>
    %61 = arith.addf %58, %60 : vector<8x128xf32>
    %62 = arith.truncf %61 : vector<8x128xf32> to vector<8x128xbf16>
    %c8_49 = arith.constant 8 : index
    %c0_50 = arith.constant 0 : index
    %63 = vector.load %arg10[%c8_49, %c0_50] : memref<16x128xbf16, #tpu.memory_space<vmem>>, vector<8x128xbf16>
    tpu.vector_store %arg10[%c8_49, %c0_50], %62 {strides = array<i32>} : memref<16x128xbf16, #tpu.memory_space<vmem>>, vector<8x128xbf16>,
    return
  }
  func.func @transform_0(%arg0: i32) -> (i32, i32) {
    %c0_i32 = arith.constant 0 : i32
    %c0_i32_0 = arith.constant 0 : i32
    return %arg0, %c0_i32 : i32, i32
  }
  func.func @transform_1(%arg0: i32) -> (i32, i32) {
    %c0_i32 = arith.constant 0 : i32
    %c0_i32_0 = arith.constant 0 : i32
    %c0_i32_1 = arith.constant 0 : i32
    return %c0_i32, %c0_i32_0 : i32, i32
  }
  func.func @transform_2(%arg0: i32) -> (i32, i32) {
    %c0_i32 = arith.constant 0 : i32
    %c0_i32_0 = arith.constant 0 : i32
    %c0_i32_1 = arith.constant 0 : i32
    return %c0_i32, %c0_i32_0 : i32, i32
  }
  func.func @transform_3(%arg0: i32) -> (i32, i32) {
    %c0_i32 = arith.constant 0 : i32
    %c0_i32_0 = arith.constant 0 : i32
    %c0_i32_1 = arith.constant 0 : i32
    return %c0_i32, %c0_i32_0 : i32, i32
  }
  func.func @transform_4(%arg0: i32) -> (i32, i32) {
    %c0_i32 = arith.constant 0 : i32
    %c0_i32_0 = arith.constant 0 : i32
    %c0_i32_1 = arith.constant 0 : i32
    return %c0_i32, %c0_i32_0 : i32, i32
  }
  func.func @transform_5(%arg0: i32) -> (i32, i32) {
    %c0_i32 = arith.constant 0 : i32
    %c0_i32_0 = arith.constant 0 : i32
    %c0_i32_1 = arith.constant 0 : i32
    return %c0_i32, %c0_i32_0 : i32, i32
  }
  func.func @transform_6(%arg0: i32) -> (i32, i32) {
    %c0_i32 = arith.constant 0 : i32
    %c0_i32_0 = arith.constant 0 : i32
    %c0_i32_1 = arith.constant 0 : i32
    return %c0_i32, %c0_i32_0 : i32, i32
  }
  func.func @transform_7(%arg0: i32) -> (i32, i32) {
    %c0_i32 = arith.constant 0 : i32
    %c0_i32_0 = arith.constant 0 : i32
    %c0_i32_1 = arith.constant 0 : i32
    return %c0_i32, %c0_i32_0 : i32, i32
  }
  func.func @transform_8(%arg0: i32) -> (i32, i32) {
    %c0_i32 = arith.constant 0 : i32
    %c0_i32_0 = arith.constant 0 : i32
    %c0_i32_1 = arith.constant 0 : i32
    return %c0_i32, %c0_i32_0 : i32, i32
  }
  func.func @transform_9(%arg0: i32) -> (i32, i32) {
    %c0_i32 = arith.constant 0 : i32
    %c0_i32_0 = arith.constant 0 : i32
    return %arg0, %c0_i32 : i32, i32
  }
}

</mosaic_0001>

<bundles_post_ra>
// kernel: tpu_custom_call.1
= control target key start
LH: loop header
LB: loop body
LE: loop exit
PB: predicated region body
PF: predicated region fallthrough
CT: control target
= control target key end

     0   :  { %vm47_vm0 = vcmask 1043456   ;;  %v978_v1 = vmov 0.0   ;;  %vm979_vm1 = vmmov 0   ;;  %vm43_vm2 = vcmask 64512   ;;  %s1235_s0 = inlined_call_operand.vmem [shape: bf16[16,8], index: 0, kind: input, shape index: {}]   ;;  %s1236_s1 = inlined_call_operand.vmem [shape: bf16[8,64], index: 1, kind: input, shape index: {}]   ;;  %s1237_s2 = inlined_call_operand.vmem [shape: f32[1,64], index: 2, kind: input, shape index: {}]   ;;  %s1238_s3 = inlined_call_operand.vmem [shape: bf16[64,128], index: 3, kind: input, shape index: {}]   ;;  %s1239_s4 = inlined_call_operand.vmem [shape: f32[1,128], index: 4, kind: input, shape index: {}]   ;;  %s1240_s5 = inlined_call_operand.vmem [shape: bf16[128,64], index: 5, kind: input, shape index: {}]   ;;  %s1241_s6 = inlined_call_operand.vmem [shape: f32[1,64], index: 6, kind: input, shape index: {}]   ;;  %s1242_s7 = inlined_call_operand.vmem [shape: bf16[64,128], index: 7, kind: input, shape index: {}]   ;;  %s1243_s8 = inlined_call_operand.vmem [shape: f32[1,128], index: 8, kind: input, shape index: {}]   ;;  %s1244_s9 = inlined_call_operand.hbm [shape: bf16[16,128], index: 9, kind: output, shape index: {}]  }
   0x1   :  { %v35_v0 = vld [vmem:[%s1236_s1] sm:$0xf]  ;;  %817 = vmatprep.subr.bf16.mxu0 %v978_v1  ;;  %823 = vmatprep.subr.bf16.mxu1 %v978_v1  ;;  %v923_v5 = vld [vmem:[%s1238_s3 + $0x8] sm:$0xff]  }
   0x2   :  { %v49_v2 = vsel %vm47_vm0, %v35_v0, 0  ;;  %v34_v3 = vld [vmem:[%s1235_s0] sm:$0xf]  ;;  %819 = vmatprep.mubr.msk.bf16.mxu0 %vm979_vm1, %v978_v1  ;;  %831 = vmatprep.mubr.msk.bf16.mxu1 %vm979_vm1, %v978_v1 }
   0x3   :  { %818 = vmatpush3.bf16.msra.mxu0 %v49_v2  ;;  %v922_v4 = vld [vmem:[%s1238_s3] sm:$0xff]  }
   0x4   :  { %835 = vmatprep.subr.bf16.mxu0 %v978_v1  ;;  %824 = vmatpush3.bf16.msra.mxu1 %v922_v4 }
   0x5   :  { %825 = vmatprep.subr.bf16.mxu1 %v978_v1 }
   0x6   :  { %820 = vmatmul.mubr.msk.bf16.vlgmr.msra.gmra.mrb[0].mxu0 %vm43_vm2, %v34_v3 }
   0x7   :  { %851 = vmatprep.mubr.msk.bf16.mxu0 %vm979_vm1, %v978_v1 }
   0x8   :  { %826 = vmatpush3.bf16.msra.mxu1 %v923_v5 }
   0x9   :  { %827 = vmatprep.subr.bf16.mxu1 %v978_v1 }
   0xa   :  { %14 = vsyncpa [#allocation3], 0  ;;  %v924_v6 = vld [vmem:[%s1238_s3 + $0x10] sm:$0xff]   ;;  %v925_v7 = vld [vmem:[%s1238_s3 + $0x18] sm:$0xff]   ;;  %vm132_vm3 = vcmask 523264   ;;  %s980_s13 = smov [#allocation2]  }
   0xb   :  { %v926_v8 = vld [vmem:[%s1240_s5] sm:$0xff]   ;;  %v927_v9 = vld [vmem:[%s1240_s5 + $0x8] sm:$0xff]   ;;  %v928_v10 = vld [vmem:[%s1240_s5 + $0x10] sm:$0xff]   ;;  %s718_s14 = sshll.u32 %s980_s13, 4  ;;  %s719_s14 = int_to_ptr.vmem [resolvable:$true] %s718_s14 }
   0xc   :  { %828 = vmatpush3.bf16.msra.mxu1 %v924_v6  ;;  %836 = vmatpush3.bf16.msra.mxu0 %v926_v8  ;;  %v929_v11 = vld [vmem:[%s1240_s5 + $0x18] sm:$0xff]   ;;  %v930_v12 = vld [vmem:[%s1240_s5 + $0x20] sm:$0xff]   ;;  %v931_v13 = vld [vmem:[%s1240_s5 + $0x28] sm:$0xff]   ;;  %p959_p1 = scmp.lt.s32.totalorder %s719_s14, %s719_s14 }
   0xd   :  { %829 = vmatprep.subr.bf16.mxu1 %v978_v1  ;;  %837 = vmatprep.subr.bf16.mxu0 %v978_v1  ;;  %v1093_v14 = vld [vmem:[%s1237_s2] ss:$0 sm:$0xff]  ;;  %v932_v22 = vld [vmem:[%s1240_s5 + $0x30] sm:$0xff]   ;;  %v933_v23 = vld [vmem:[%s1240_s5 + $0x38] sm:$0xff]  }
   0xe   :  { %v934_v24 = vld [vmem:[%s1242_s7] sm:$0xff]   ;;  %v935_v25 = vld [vmem:[%s1242_s7 + $0x8] sm:$0xff]   ;;  %v936_v26 = vld [vmem:[%s1242_s7 + $0x10] sm:$0xff]  }
   0xf   :  { %v1122_v27 = vld [vmem:[%s1239_s4] ss:$0 sm:$0xff]  ;;  %v937_v35 = vld [vmem:[%s1242_s7 + $0x18] sm:$0xff]   ;;  %v375_v46 = vld [vmem:[%s1235_s0 + $0x4] sm:$0xf] }
  0x10   :  { %830 = vmatpush3.bf16.msra.mxu1 %v925_v7  ;;  %838 = vmatpush3.bf16.msra.mxu0 %v927_v9  ;;  %v1134_v36 = vld [vmem:[%s1241_s6] ss:$0 sm:$0xff]  ;;  %v939_v48 = vld [vmem:[%s1238_s3 + $0x8] sm:$0xff]   ;;  %v940_v49 = vld [vmem:[%s1238_s3 + $0x10] sm:$0xff]  }
  0x11   :  { %855 = vmatprep.subr.bf16.mxu1 %v978_v1  ;;  %839 = vmatprep.subr.bf16.mxu0 %v978_v1  ;;  %v376_v40 = vld [vmem:[%s1236_s1] sm:$0xf]  ;;  %v941_v50 = vld [vmem:[%s1238_s3 + $0x18] sm:$0xff]   ;;  %v943_v52 = vld [vmem:[%s1240_s5 + $0x8] sm:$0xff]  }
  0x12   :  { %v388_v44 = vsel %vm47_vm0, %v376_v40, 0  ;;  %v938_v47 = vld [vmem:[%s1238_s3] sm:$0xff]   ;;  %v944_v53 = vld [vmem:[%s1240_s5 + $0x10] sm:$0xff]   ;;  %v945_v54 = vld [vmem:[%s1240_s5 + $0x18] sm:$0xff]  }
  0x13   :  { %v942_v51 = vld [vmem:[%s1240_s5] sm:$0xff]   ;;  %v947_v56 = vld [vmem:[%s1240_s5 + $0x28] sm:$0xff]   ;;  %v948_v8 = vld [vmem:[%s1240_s5 + $0x30] sm:$0xff]  }
  0x14   :  { %840 = vmatpush3.bf16.msra.mxu0 %v928_v10  ;;  %v946_v55 = vld [vmem:[%s1240_s5 + $0x20] sm:$0xff]   ;;  %v949_v9 = vld [vmem:[%s1240_s5 + $0x38] sm:$0xff]  }
  0x15   :  { %841 = vmatprep.subr.bf16.mxu0 %v978_v1  ;;  %v746_v57 = vld [vmem:[%s1243_s8] ss:$0 sm:$0xff] }
  0x16   :  { %v950_v10 = vld [vmem:[%s1242_s7] sm:$0xff]  }
  0x18   :  { %842 = vmatpush3.bf16.msra.mxu0 %v929_v11  ;;  %v951_v11 = vld [vmem:[%s1242_s7 + $0x8] sm:$0xff]  }
  0x19   :  { %843 = vmatprep.subr.bf16.mxu0 %v978_v1 }
  0x1c   :  { %844 = vmatpush3.bf16.msra.mxu0 %v930_v12 }
  0x1d   :  { %845 = vmatprep.subr.bf16.mxu0 %v978_v1 }
  0x20   :  { %846 = vmatpush3.bf16.msra.mxu0 %v931_v13 }
  0x21   :  { %847 = vmatprep.subr.bf16.mxu0 %v978_v1 }
  0x24   :  { %848 = vmatpush3.bf16.msra.mxu0 %v932_v22 }
  0x25   :  { %849 = vmatprep.subr.bf16.mxu0 %v978_v1 }
  0x28   :  { %850 = vmatpush3.bf16.msra.mxu0 %v933_v23 }
  0x29   :  { %873 = vmatprep.subr.bf16.mxu0 %v978_v1 }
  0xd9   :  { %v85_v15 = vpop.f32.mrb[0].mxu0 }
  0xda   :  { %v86_v16 = vadd.f32 %v1093_v14, %v85_v15  ;;  %v821_v17 = vpop.f32.mrb[1].mxu0 }
  0xdb   :  { %v88_v18 = vpop.f32.mrb[2].mxu0 }
  0xdc   :  { %v91_v19 = vmax.f32 %v86_v16, 0.0  ;;  %v822_v20 = vpop.f32.mrb[3].mxu0 }
  0xdd   :  { %v953_v20 = vld [vmem:[%s1242_s7 + $0x18] sm:$0xff]  }
  0xde   :  { %v92_v21 = vpack.c.bf16 %v91_v19, %v91_v19  ;;  %v952_v19 = vld [vmem:[%s1242_s7 + $0x10] sm:$0xff]   ;;  %s954_s7 = scalar_lea.vmem %s719_s14, 128 }
  0xdf   :  { %p955_p0 = scmp.ne.s32.totalorder %s719_s14, %s954_s7  ;;  %p960_p2 = scmp.lt.s32.totalorder %s954_s7, %s954_s7 }
  0xe0   :  { %832 = vmatmul.mubr.msk.bf16.vlgmr.msra.gmra.mrb[0].mxu1 %vm132_vm3, %v92_v21 }
  0xe1   :  { %863 = vmatprep.mubr.msk.bf16.mxu1 %vm979_vm1, %v978_v1  ;;  %856 = vmatpush3.bf16.msra.mxu1 %v934_v24  ;;  %p961_p3 = por %p960_p2, %p959_p1 }
  0xe2   :  { %857 = vmatprep.subr.bf16.mxu1 %v978_v1 }
  0xe3   :  { %p962_p4 = pnand %p961_p3, %p955_p0 }
  0xe5   :  { %858 = vmatpush3.bf16.msra.mxu1 %v935_v25 }
  0xe6   :  { %859 = vmatprep.subr.bf16.mxu1 %v978_v1 }
  0xe9   :  { %860 = vmatpush3.bf16.msra.mxu1 %v936_v26 }
  0xea   :  { %861 = vmatprep.subr.bf16.mxu1 %v978_v1 }
  0xed   :  { %862 = vmatpush3.bf16.msra.mxu1 %v937_v35 }
  0xee   :  { %867 = vmatprep.subr.bf16.mxu1 %v978_v1 }
 0x1b3   :  { %v170_v28 = vpop.f32.mrb[0].mxu1 }
 0x1b4   :  { %v171_v29 = vadd.f32 %v1122_v27, %v170_v28  ;;  %v833_v30 = vpop.f32.mrb[1].mxu1 }
 0x1b5   :  { %v173_v31 = vpop.f32.mrb[2].mxu1 }
 0x1b6   :  { %v176_v32 = vmax.f32 %v171_v29, 0.0  ;;  %v834_v33 = vpop.f32.mrb[3].mxu1 }
 0x1b8   :  { %v177_v34 = vpack.c.bf16 %v176_v32, %v176_v32 }
 0x1ba   :  { %852 = vmatmul.mubr.bf16.vlgmr.msra.gmra.mrb[4].mxu0 %v177_v34 }
 0x1bb   :  { %881 = vmatprep.mubr.msk.bf16.mxu0 %vm979_vm1, %v978_v1  ;;  %874 = vmatpush3.bf16.msra.mxu0 %v938_v47 }
 0x1bc   :  { %875 = vmatprep.subr.bf16.mxu0 %v978_v1 }
 0x1bf   :  { %876 = vmatpush3.bf16.msra.mxu0 %v939_v48 }
 0x1c0   :  { %877 = vmatprep.subr.bf16.mxu0 %v978_v1 }
 0x1c3   :  { %878 = vmatpush3.bf16.msra.mxu0 %v940_v49 }
 0x1c4   :  { %879 = vmatprep.subr.bf16.mxu0 %v978_v1 }
 0x1c7   :  { %880 = vmatpush3.bf16.msra.mxu0 %v941_v50 }
 0x1c8   :  { %905 = vmatprep.subr.bf16.mxu0 %v978_v1 }
 0x28d   :  { %v283_v37 = vpop.f32.mrb[4].mxu0 }
 0x28e   :  { %v284_v38 = vadd.f32 %v1134_v36, %v283_v37  ;;  %v853_v39 = vpop.f32.mrb[5].mxu0 }
 0x28f   :  { %v286_v41 = vpop.f32.mrb[6].mxu0 }
 0x290   :  { %v289_v42 = vmax.f32 %v284_v38, 0.0  ;;  %v854_v43 = vpop.f32.mrb[7].mxu0 }
 0x292   :  { %v290_v45 = vpack.c.bf16 %v289_v42, %v289_v42 }
 0x294   :  { %864 = vmatmul.mubr.msk.bf16.vlgmr.msra.gmra.mrb[4].mxu1 %vm132_vm3, %v290_v45 }
 0x295   :  { %868 = vmatpush3.bf16.msra.mxu1 %v388_v44  ;;  %869 = vmatprep.mubr.msk.bf16.mxu1 %vm979_vm1, %v978_v1 }
 0x296   :  { %885 = vmatprep.subr.bf16.mxu1 %v978_v1 }
 0x29c   :  { %870 = vmatmul.mubr.msk.bf16.vlgmr.msra.gmra.mrb[8].mxu1 %vm43_vm2, %v375_v46 }
 0x29d   :  { %901 = vmatprep.mubr.msk.bf16.mxu1 %vm979_vm1, %v978_v1  ;;  %886 = vmatpush3.bf16.msra.mxu1 %v942_v51 }
 0x29e   :  { %887 = vmatprep.subr.bf16.mxu1 %v978_v1 }
 0x2a1   :  { %888 = vmatpush3.bf16.msra.mxu1 %v943_v52 }
 0x2a2   :  { %889 = vmatprep.subr.bf16.mxu1 %v978_v1 }
 0x2a5   :  { %890 = vmatpush3.bf16.msra.mxu1 %v944_v53 }
 0x2a6   :  { %891 = vmatprep.subr.bf16.mxu1 %v978_v1 }
 0x2a9   :  { %892 = vmatpush3.bf16.msra.mxu1 %v945_v54 }
 0x2aa   :  { %893 = vmatprep.subr.bf16.mxu1 %v978_v1 }
 0x2ad   :  { %894 = vmatpush3.bf16.msra.mxu1 %v946_v55 }
 0x2ae   :  { %895 = vmatprep.subr.bf16.mxu1 %v978_v1 }
 0x2b1   :  { %896 = vmatpush3.bf16.msra.mxu1 %v947_v56 }
 0x2b2   :  { %897 = vmatprep.subr.bf16.mxu1 %v978_v1 }
 0x2b5   :  { %898 = vmatpush3.bf16.msra.mxu1 %v948_v8 }
 0x2b6   :  { %899 = vmatprep.subr.bf16.mxu1 %v978_v1 }
 0x2b9   :  { %900 = vmatpush3.bf16.msra.mxu1 %v949_v9 }
 0x367   :  { %v367_v58 = vpop.f32.mrb[4].mxu1 }
 0x368   :  { %v368_v59 = vadd.f32 %v746_v57, %v367_v58  ;;  %v865_v60 = vpop.f32.mrb[5].mxu1 }
 0x369   :  { %v370_v61 = vpop.f32.mrb[6].mxu1 }
 0x36a   :  { %v373_v62 = vpack.c.bf16 %v368_v59, %v368_v59  ;;  %v866_v63 = vpop.f32.mrb[7].mxu1 }
 0x36c   :  { %374 = vst [vmem:[#allocation2] sm:$0xf] %v373_v62 }
 0x36f   :  { %v424_v0 = vpop.f32.mrb[8].mxu1 }
 0x370   :  { %v425_v2 = vadd.f32 %v1093_v14, %v424_v0  ;;  %v871_v3 = vpop.f32.mrb[9].mxu1 }
 0x371   :  { %v427_v4 = vpop.f32.mrb[10].mxu1 }
 0x372   :  { %v430_v5 = vmax.f32 %v425_v2, 0.0  ;;  %v872_v6 = vpop.f32.mrb[11].mxu1 }
 0x374   :  { %v431_v7 = vpack.c.bf16 %v430_v5, %v430_v5 }
 0x376   :  { %882 = vmatmul.mubr.msk.bf16.vlgmr.msra.gmra.mrb[8].mxu0 %vm132_vm3, %v431_v7 }
 0x377   :  { %913 = vmatprep.mubr.msk.bf16.mxu0 %vm979_vm1, %v978_v1  ;;  %906 = vmatpush3.bf16.msra.mxu0 %v950_v10 }
 0x378   :  { %907 = vmatprep.subr.bf16.mxu0 %v978_v1 }
 0x37b   :  { %908 = vmatpush3.bf16.msra.mxu0 %v951_v11 }
 0x37c   :  { %909 = vmatprep.subr.bf16.mxu0 %v978_v1 }
 0x37f   :  { %910 = vmatpush3.bf16.msra.mxu0 %v952_v19 }
 0x380   :  { %911 = vmatprep.subr.bf16.mxu0 %v978_v1 }
 0x383   :  { %912 = vmatpush3.bf16.msra.mxu0 %v953_v20 }
 0x449   :  { %v508_v12 = vpop.f32.mrb[8].mxu0 }
 0x44a   :  { %v509_v13 = vadd.f32 %v1122_v27, %v508_v12  ;;  %v883_v14 = vpop.f32.mrb[9].mxu0 }
 0x44b   :  { %v511_v15 = vpop.f32.mrb[10].mxu0 }
 0x44c   :  { %v514_v16 = vmax.f32 %v509_v13, 0.0  ;;  %v884_v17 = vpop.f32.mrb[11].mxu0 }
 0x44e   :  { %v515_v18 = vpack.c.bf16 %v514_v16, %v514_v16 }
 0x450   :  { %902 = vmatmul.mubr.bf16.vlgmr.msra.gmra.mrb[12].mxu1 %v515_v18 }
 0x523   :  { %v621_v21 = vpop.f32.mrb[12].mxu1 }
 0x524   :  { %v622_v22 = vadd.f32 %v1134_v36, %v621_v21  ;;  %v903_v23 = vpop.f32.mrb[13].mxu1 }
 0x525   :  { %v624_v24 = vpop.f32.mrb[14].mxu1 }
 0x526   :  { %v627_v25 = vmax.f32 %v622_v22, 0.0  ;;  %v904_v26 = vpop.f32.mrb[15].mxu1 }
 0x528   :  { %v628_v27 = vpack.c.bf16 %v627_v25, %v627_v25 }
 0x52a   :  { %914 = vmatmul.mubr.msk.bf16.vlgmr.msra.gmra.mrb[12].mxu0 %vm132_vm3, %v628_v27 }
 0x5fd   :  { %v705_v28 = vpop.f32.mrb[12].mxu0 }
 0x5fe   :  { %v706_v29 = vadd.f32 %v746_v57, %v705_v28  ;;  %v915_v1 = vpop.f32.mrb[13].mxu0 }
 0x5ff   :  { %v708_v30 = vpop.f32.mrb[14].mxu0 }
 0x600   :  { %v711_v31 = vpack.c.bf16 %v706_v29, %v706_v29  ;;  %v916_v32 = vpop.f32.mrb[15].mxu0 }
 0x602   :  { %712 = vst [vmem:[#allocation2 + $0x4] sm:$0xf] %v711_v31 }
 0x603   :  { %965 = shalt.err (!%p962_p4)
}
 0x604   :  { %s966_s16 = scalar_lea.hbm %s1244_s9, 128 }
 0x605   :  { %p967_p5 = scmp.ne.s32.totalorder %s1244_s9, %s966_s16  ;;  %p970_p6 = scmp.lt.u32.totalorder %s966_s16, %s1244_s9 }
 0x607   :  { %p972_p7 = pnand %p970_p6, %p967_p5 }
 0x609   :  { %975 = shalt.err (!%p972_p7)
}
 0x60a   :  { %s981_s3 = smov 64   ;;  %s982_s21 = smov 4  }
 0x60b   :  { %724 = dma.vmem_to_hbm [thread:$0]  %s719_s14, 128, %s1244_s9, [#allocation3], %s981_s3, %s981_s3, %s982_s21  }
 0x60c   :  { %976 = dma.done.wait [#allocation3], 128  }
 0x60d   :  { %977 = vsyncadd [#allocation3], 4294967168 }
 0x60e   :  { %728 = vsyncpa [#allocation3], 1 }

</bundles_post_ra>
